<compile_context>
chip_gen: v5e
topology: v5e:2x2
jax: 0.10.0
libtpu: 0.0.40
codegen_flags: <defaults>
</compile_context>

<pallas_src>
import functools
import math

import jax
import jax.numpy as jnp
from jax.experimental import pallas as pl
from jax.experimental.pallas import tpu as pltpu


_LANE = 128      # merged Q output is one full lane width (q1 -> lane 0, q2 -> lane 1)
_SUBLANE = 8
_LN_EPS = 1e-5   # torch.nn.LayerNorm default eps


def _round_up(x, m):
    return ((x + m - 1) // m) * m


def _mlp_critic_kernel(st_ref, ac_ref,
                       ws_ref, wa_ref, w1_ref, w2_ref, w3_ref,
                       w4s_ref, w4a_ref, w5_ref, w6_ref, w7_ref,
                       bias_ref, hb_ref,
                       out_ref, *, eps):
    """Fused twin-Q critic for one batch tile: bf16 MXU matmuls, f32 elementwise/LN."""
    st = st_ref[...].astype(jnp.bfloat16)          # (TB, S)
    ac = ac_ref[...].astype(jnp.bfloat16)          # (TB, A)
    bias = bias_ref[...]                           # (10, H) f32 packed bias/LN params

    def head(ws, wa, w1, w2, w3, b0, b1, b2, g, t):
        # layer 0: split state/action matmuls (sa never concatenated in HBM)
        h = (jnp.dot(st, ws[...], preferred_element_type=jnp.float32)
             + jnp.dot(ac, wa[...], preferred_element_type=jnp.float32)
             + b0)
        h = jnp.maximum(h, 0.0)
        h = jnp.dot(h.astype(jnp.bfloat16), w1[...],
                    preferred_element_type=jnp.float32) + b1
        h = jnp.maximum(h, 0.0)
        h = jnp.dot(h.astype(jnp.bfloat16), w2[...],
                    preferred_element_type=jnp.float32) + b2
        # LayerNorm: one-pass moments (single extra cross-lane reduction), biased variance.
        mu = jnp.mean(h, axis=-1, keepdims=True)
        ms = jnp.mean(h * h, axis=-1, keepdims=True)
        var = jnp.maximum(ms - mu * mu, 0.0)
        h = (h - mu) * jax.lax.rsqrt(var + eps)
        h = jnp.maximum(h * g + t, 0.0)
        # final weight zero-padded to 128 lanes: head 1 live in lane 0, head 2 in lane 1.
        return jnp.dot(h.astype(jnp.bfloat16), w3[...],
                       preferred_element_type=jnp.float32)

    q1 = head(ws_ref, wa_ref, w1_ref, w2_ref, w3_ref,
              bias[0:1], bias[1:2], bias[2:3], bias[3:4], bias[4:5])
    q2 = head(w4s_ref, w4a_ref, w5_ref, w6_ref, w7_ref,
              bias[5:6], bias[6:7], bias[7:8], bias[8:9], bias[9:10])
    # q1 is nonzero only in lane 0, q2 only in lane 1 -> one merged lane-dense store.
    out_ref[...] = (q1 + q2 + hb_ref[...]).astype(out_ref.dtype)


def mlp_critic_forward(state, action, params, *, batch_tile=None):
    """state: (B, S), action: (B, A). Returns (q1, q2), each (B, 1) float32."""
    (w, b, w1, b1, w2, b2, g2, t2, w3, b3,
     w4, b4, w5, b5, w6, b6, g6, t6, w7, b7) = params

    state = state.astype(jnp.float32)
    action = action.astype(jnp.float32)
    B, S = state.shape
    A = action.shape[1]
    H = w.shape[1]

    # Balanced batch tiles (<= 512 rows). For non-tiny batches force >= 2 grid steps so
    # the "parallel" axis can shard across v7x's two TensorCores.
    B_sub = _round_up(max(B, 1), _SUBLANE)
    if batch_tile is None:
        n_tiles = pl.cdiv(B_sub, 512)
        if n_tiles == 1 and B_sub >= 16:
            n_tiles = 2
        batch_tile = _round_up(pl.cdiv(B_sub, n_tiles), _SUBLANE)
    else:
        batch_tile = _round_up(batch_tile, _SUBLANE)
    n_tiles = pl.cdiv(B_sub, batch_tile)
    B_pad = n_tiles * batch_tile

    if B_pad != B:
        state = jnp.pad(state, ((0, B_pad - B), (0, 0)))
        action = jnp.pad(action, ((0, B_pad - B), (0, 0)))

    bf16 = jnp.bfloat16
    # Layer-0 weights split into state / action rows (weights stored as (in, out)).
    ws, wa = w[:S].astype(bf16), w[S:].astype(bf16)
    w4s, w4a = w4[:S].astype(bf16), w4[S:].astype(bf16)
    w1b, w2b = w1.astype(bf16), w2.astype(bf16)
    w5b, w6b = w5.astype(bf16), w6.astype(bf16)
    # Head-output weights padded to 128 lanes: q1 live column -> lane 0, q2 -> lane 1.
    w3m = jnp.pad(w3, ((0, 0), (0, _LANE - 1))).astype(bf16)
    w7m = jnp.pad(w7, ((0, 0), (1, _LANE - 2))).astype(bf16)
    head_bias = jnp.zeros((1, _LANE), jnp.float32)
    head_bias = head_bias.at[0, 0].set(b3[0]).at[0, 1].set(b7[0])
    # All (H,) bias / LayerNorm vectors packed into a single (10, H) f32 block.
    bias_pack = jnp.stack([b, b1, b2, g2, t2, b4, b5, b6, g6, t6],
                          axis=0).astype(jnp.float32)

    inputs = (state, action,
              ws, wa, w1b, w2b, w3m,
              w4s, w4a, w5b, w6b, w7m,
              bias_pack, head_bias)

    def const_spec(arr):
        # Constant-index params: single-buffered, resident in VMEM across the whole grid.
        return pl.BlockSpec(arr.shape, lambda i: (0,) * arr.ndim,
                            pipeline_mode=pl.Buffered(1))

    in_specs = [pl.BlockSpec((batch_tile, S), lambda i: (i, 0)),
                pl.BlockSpec((batch_tile, A), lambda i: (i, 0))]
    in_specs += [const_spec(arr) for arr in inputs[2:]]
    out_spec = pl.BlockSpec((batch_tile, _LANE), lambda i: (i, 0))

    # Rough VMEM budget: bf16 weights single-buffered, double-buffered I/O tiles, f32 temps.
    weight_bytes = 2 * (2 * (S + A) * H + 4 * H * H + 2 * H * _LANE)
    bias_bytes = 4 * (16 * max(H, _LANE) + _SUBLANE * _LANE)
    io_bytes = 2 * 4 * batch_tile * (S + A + _LANE)
    act_bytes = 6 * 4 * batch_tile * H
    vmem_bytes = int(1.5 * (weight_bytes + bias_bytes + io_bytes + act_bytes))

    compiler_kwargs = dict(dimension_semantics=("parallel",))
    if vmem_bytes > 12 * 1024 * 1024:
        # TODO(synk): for very large hidden_dim, add a K-reduction grid axis over H with a
        # VMEM accumulator (stream weights from HBM) instead of only raising the limit.
        try:
            cap = pltpu.get_tpu_info().vmem_capacity_bytes
        except Exception:
            cap = 64 * 1024 * 1024          # v7x floor: 64 MiB per TensorCore
        compiler_kwargs["vmem_limit_bytes"] = min(vmem_bytes, int(cap * 0.8))

    out = pl.pallas_call(
        functools.partial(_mlp_critic_kernel, eps=_LN_EPS),
        out_shape=jax.ShapeDtypeStruct((B_pad, _LANE), jnp.float32),
        grid_spec=pltpu.PrefetchScalarGridSpec(
            num_scalar_prefetch=0,
            grid=(n_tiles,),
            in_specs=in_specs,
            out_specs=out_spec,
        ),
        compiler_params=pltpu.CompilerParams(**compiler_kwargs),
    )(*inputs)

    return out[:B, 0:1], out[:B, 1:2]


def init_mlp_critic_params(key, state_dim, action_dim, hidden_dim=256):
    """nn.Linear-style init (U(-1/sqrt(fan_in), 1/sqrt(fan_in))); LayerNorm gamma=1, beta=0.

    Weights are returned already transposed to (in_features, out_features)."""
    in_dim = state_dim + action_dim
    keys = jax.random.split(key, 16)

    def linear(kw, kb, fan_in, fan_out):
        bound = 1.0 / math.sqrt(fan_in)
        wgt = jax.random.uniform(kw, (fan_in, fan_out), jnp.float32, -bound, bound)
        bias = jax.random.uniform(kb, (fan_out,), jnp.float32, -bound, bound)
        return wgt, bias

    w, b = linear(keys[0], keys[1], in_dim, hidden_dim)
    w1, b1 = linear(keys[2], keys[3], hidden_dim, hidden_dim)
    w2, b2 = linear(keys[4], keys[5], hidden_dim, hidden_dim)
    g2 = jnp.ones((hidden_dim,), jnp.float32)
    t2 = jnp.zeros((hidden_dim,), jnp.float32)
    w3, b3 = linear(keys[6], keys[7], hidden_dim, 1)
    w4, b4 = linear(keys[8], keys[9], in_dim, hidden_dim)
    w5, b5 = linear(keys[10], keys[11], hidden_dim, hidden_dim)
    w6, b6 = linear(keys[12], keys[13], hidden_dim, hidden_dim)
    g6 = jnp.ones((hidden_dim,), jnp.float32)
    t6 = jnp.zeros((hidden_dim,), jnp.float32)
    w7, b7 = linear(keys[14], keys[15], hidden_dim, 1)
    return (w, b, w1, b1, w2, b2, g2, t2, w3, b3,
            w4, b4, w5, b5, w6, b6, g6, t6, w7, b7)


def mlp_critic_reference(state, action, params, eps=_LN_EPS):
    """Pure f32 JAX reference matching the PyTorch module semantics."""
    (w, b, w1, b1, w2, b2, g2, t2, w3, b3,
     w4, b4, w5, b5, w6, b6, g6, t6, w7, b7) = params
    sa = jnp.concatenate([state, action], axis=1)

    def head(wa, ba, wb, bb, wc, bc, g, t, wd, bd):
        h = jnp.maximum(sa @ wa + ba, 0.0)
        h = jnp.maximum(h @ wb + bb, 0.0)
        h = h @ wc + bc
        mu = h.mean(-1, keepdims=True)
        var = ((h - mu) ** 2).mean(-1, keepdims=True)
        h = (h - mu) / jnp.sqrt(var + eps)
        h = jnp.maximum(h * g + t, 0.0)
        return h @ wd + bd

    q1 = head(w, b, w1, b1, w2, b2, g2, t2, w3, b3)
    q2 = head(w4, b4, w5, b5, w6, b6, g6, t6, w7, b7)
    return q1, q2


if __name__ == "__main__":
    key = jax.random.PRNGKey(0)
    k_param, k_state, k_action = jax.random.split(key, 3)

    batch = 2
    state_dim = 16
    action_dim = 8
    hidden_dim = 32

    params = init_mlp_critic_params(k_param, state_dim, action_dim, hidden_dim)
    state = jax.random.normal(k_state, (batch, state_dim), jnp.float32)
    action = jax.random.normal(k_action, (batch, action_dim), jnp.float32)

    q1, q2 = mlp_critic_forward(state, action, params)
    (q1, q2) = jax.block_until_ready((q1, q2))

    r1, r2 = mlp_critic_reference(state, action, params)
    assert q1.shape == (batch, 1) and q2.shape == (batch, 1)
    # bf16 MXU inputs (f32 accumulation) -> slightly looser tolerance vs the f32 reference.
    assert jnp.allclose(q1, r1, atol=5e-2, rtol=5e-2), "q1 mismatch vs. reference"
    assert jnp.allclose(q2, r2, atol=5e-2, rtol=5e-2), "q2 mismatch vs. reference"

    print("KERNEL_OK")
</pallas_src>

<mosaic_0001>
module attributes {stable_mosaic.version = 11 : i64} {
  func.func @_mlp_critic_kernel(%arg0: i32, %arg1: memref<8x16xf32, #tpu.memory_space<vmem>>, %arg2: memref<8x8xf32, #tpu.memory_space<vmem>>, %arg3: memref<16x32xbf16, #tpu.memory_space<vmem>>, %arg4: memref<8x32xbf16, #tpu.memory_space<vmem>>, %arg5: memref<32x32xbf16, #tpu.memory_space<vmem>>, %arg6: memref<32x32xbf16, #tpu.memory_space<vmem>>, %arg7: memref<32x128xbf16, #tpu.memory_space<vmem>>, %arg8: memref<16x32xbf16, #tpu.memory_space<vmem>>, %arg9: memref<8x32xbf16, #tpu.memory_space<vmem>>, %arg10: memref<32x32xbf16, #tpu.memory_space<vmem>>, %arg11: memref<32x32xbf16, #tpu.memory_space<vmem>>, %arg12: memref<32x128xbf16, #tpu.memory_space<vmem>>, %arg13: memref<10x32xf32, #tpu.memory_space<vmem>>, %arg14: memref<1x128xf32, #tpu.memory_space<vmem>>, %arg15: memref<8x128xf32, #tpu.memory_space<vmem>>) attributes {dimension_semantics = [#tpu.dimension_semantics<parallel>], iteration_bounds = array<i64: 1>, scalar_prefetch = 0 : i64, scratch_operands = 0 : i64, tpu.core_type = #tpu.core_type<tc>, window_params = [{transform_indices = @transform_0, window_bounds = array<i64: 8, 16>}, {transform_indices = @transform_1, window_bounds = array<i64: 8, 8>}, {pipeline_mode = #tpu.pipeline_mode<synchronous>, transform_indices = @transform_2, window_bounds = array<i64: 16, 32>}, {pipeline_mode = #tpu.pipeline_mode<synchronous>, transform_indices = @transform_3, window_bounds = array<i64: 8, 32>}, {pipeline_mode = #tpu.pipeline_mode<synchronous>, transform_indices = @transform_4, window_bounds = array<i64: 32, 32>}, {pipeline_mode = #tpu.pipeline_mode<synchronous>, transform_indices = @transform_5, window_bounds = array<i64: 32, 32>}, {pipeline_mode = #tpu.pipeline_mode<synchronous>, transform_indices = @transform_6, window_bounds = array<i64: 32, 128>}, {pipeline_mode = #tpu.pipeline_mode<synchronous>, transform_indices = @transform_7, window_bounds = array<i64: 16, 32>}, {pipeline_mode = #tpu.pipeline_mode<synchronous>, transform_indices = @transform_8, window_bounds = array<i64: 8, 32>}, {pipeline_mode = #tpu.pipeline_mode<synchronous>, transform_indices = @transform_9, window_bounds = array<i64: 32, 32>}, {pipeline_mode = #tpu.pipeline_mode<synchronous>, transform_indices = @transform_10, window_bounds = array<i64: 32, 32>}, {pipeline_mode = #tpu.pipeline_mode<synchronous>, transform_indices = @transform_11, window_bounds = array<i64: 32, 128>}, {pipeline_mode = #tpu.pipeline_mode<synchronous>, transform_indices = @transform_12, window_bounds = array<i64: 10, 32>}, {pipeline_mode = #tpu.pipeline_mode<synchronous>, transform_indices = @transform_13, window_bounds = array<i64: 1, 128>}, {transform_indices = @transform_14, window_bounds = array<i64: 8, 128>}]} {
    %c0 = arith.constant 0 : index
    %c0_0 = arith.constant 0 : index
    %0 = vector.load %arg1[%c0, %c0_0] : memref<8x16xf32, #tpu.memory_space<vmem>>, vector<8x16xf32>
    %1 = arith.truncf %0 : vector<8x16xf32> to vector<8x16xbf16>
    %c0_1 = arith.constant 0 : index
    %c0_2 = arith.constant 0 : index
    %2 = vector.load %arg2[%c0_1, %c0_2] : memref<8x8xf32, #tpu.memory_space<vmem>>, vector<8x8xf32>
    %3 = arith.truncf %2 : vector<8x8xf32> to vector<8x8xbf16>
    %c0_3 = arith.constant 0 : index
    %c0_4 = arith.constant 0 : index
    %4 = vector.load %arg13[%c0_3, %c0_4] : memref<10x32xf32, #tpu.memory_space<vmem>>, vector<10x32xf32>
    %5 = vector.extract_strided_slice %4 {offsets = [0, 0], sizes = [1, 32], strides = [1, 1]} : vector<10x32xf32> to vector<1x32xf32>
    %6 = vector.extract_strided_slice %4 {offsets = [1, 0], sizes = [1, 32], strides = [1, 1]} : vector<10x32xf32> to vector<1x32xf32>
    %7 = vector.extract_strided_slice %4 {offsets = [2, 0], sizes = [1, 32], strides = [1, 1]} : vector<10x32xf32> to vector<1x32xf32>
    %8 = vector.extract_strided_slice %4 {offsets = [3, 0], sizes = [1, 32], strides = [1, 1]} : vector<10x32xf32> to vector<1x32xf32>
    %9 = vector.extract_strided_slice %4 {offsets = [4, 0], sizes = [1, 32], strides = [1, 1]} : vector<10x32xf32> to vector<1x32xf32>
    %c0_5 = arith.constant 0 : index
    %c0_6 = arith.constant 0 : index
    %10 = vector.load %arg3[%c0_5, %c0_6] : memref<16x32xbf16, #tpu.memory_space<vmem>>, vector<16x32xbf16>
    %cst = arith.constant dense<0.000000e+00> : vector<8x32xf32>
    %11 = tpu.matmul %1, %10, %cst {dimension_numbers = #tpu.dot_dimension_numbers<[1], [0], [0], [1], [0, 0, 1, 1], [], []>} : vector<8x16xbf16>, vector<16x32xbf16>, vector<8x32xf32> -> vector<8x32xf32>
    %c0_7 = arith.constant 0 : index
    %c0_8 = arith.constant 0 : index
    %12 = vector.load %arg4[%c0_7, %c0_8] : memref<8x32xbf16, #tpu.memory_space<vmem>>, vector<8x32xbf16>
    %cst_9 = arith.constant dense<0.000000e+00> : vector<8x32xf32>
    %13 = tpu.matmul %3, %12, %cst_9 {dimension_numbers = #tpu.dot_dimension_numbers<[1], [0], [0], [1], [0, 0, 1, 1], [], []>} : vector<8x8xbf16>, vector<8x32xbf16>, vector<8x32xf32> -> vector<8x32xf32>
    %14 = arith.addf %11, %13 : vector<8x32xf32>
    %15 = vector.broadcast %5 : vector<1x32xf32> to vector<8x32xf32>
    %16 = arith.addf %14, %15 : vector<8x32xf32>
    %cst_10 = arith.constant 0.000000e+00 : f32
    %17 = vector.broadcast %cst_10 : f32 to vector<8x32xf32>
    %18 = arith.maximumf %16, %17 : vector<8x32xf32>
    %19 = arith.truncf %18 : vector<8x32xf32> to vector<8x32xbf16>
    %c0_11 = arith.constant 0 : index
    %c0_12 = arith.constant 0 : index
    %20 = vector.load %arg5[%c0_11, %c0_12] : memref<32x32xbf16, #tpu.memory_space<vmem>>, vector<32x32xbf16>
    %cst_13 = arith.constant dense<0.000000e+00> : vector<8x32xf32>
    %21 = tpu.matmul %19, %20, %cst_13 {dimension_numbers = #tpu.dot_dimension_numbers<[1], [0], [0], [1], [0, 0, 1, 1], [], []>} : vector<8x32xbf16>, vector<32x32xbf16>, vector<8x32xf32> -> vector<8x32xf32>
    %22 = vector.broadcast %6 : vector<1x32xf32> to vector<8x32xf32>
    %23 = arith.addf %21, %22 : vector<8x32xf32>
    %cst_14 = arith.constant 0.000000e+00 : f32
    %24 = vector.broadcast %cst_14 : f32 to vector<8x32xf32>
    %25 = arith.maximumf %23, %24 : vector<8x32xf32>
    %26 = arith.truncf %25 : vector<8x32xf32> to vector<8x32xbf16>
    %c0_15 = arith.constant 0 : index
    %c0_16 = arith.constant 0 : index
    %27 = vector.load %arg6[%c0_15, %c0_16] : memref<32x32xbf16, #tpu.memory_space<vmem>>, vector<32x32xbf16>
    %cst_17 = arith.constant dense<0.000000e+00> : vector<8x32xf32>
    %28 = tpu.matmul %26, %27, %cst_17 {dimension_numbers = #tpu.dot_dimension_numbers<[1], [0], [0], [1], [0, 0, 1, 1], [], []>} : vector<8x32xbf16>, vector<32x32xbf16>, vector<8x32xf32> -> vector<8x32xf32>
    %29 = vector.broadcast %7 : vector<1x32xf32> to vector<8x32xf32>
    %30 = arith.addf %28, %29 : vector<8x32xf32>
    %cst_18 = arith.constant dense<0.000000e+00> : vector<8xf32>
    %31 = vector.multi_reduction <add>, %30, %cst_18 [1] : vector<8x32xf32> to vector<8xf32>
    %32 = vector.shape_cast %31 : vector<8xf32> to vector<8x1xf32>
    %cst_19 = arith.constant 3.200000e+01 : f32
    %33 = vector.broadcast %cst_19 : f32 to vector<8x1xf32>
    %34 = arith.divf %32, %33 : vector<8x1xf32>
    %35 = arith.mulf %30, %30 : vector<8x32xf32>
    %cst_20 = arith.constant dense<0.000000e+00> : vector<8xf32>
    %36 = vector.multi_reduction <add>, %35, %cst_20 [1] : vector<8x32xf32> to vector<8xf32>
    %37 = vector.shape_cast %36 : vector<8xf32> to vector<8x1xf32>
    %cst_21 = arith.constant 3.200000e+01 : f32
    %38 = vector.broadcast %cst_21 : f32 to vector<8x1xf32>
    %39 = arith.divf %37, %38 : vector<8x1xf32>
    %40 = arith.mulf %34, %34 : vector<8x1xf32>
    %41 = arith.subf %39, %40 : vector<8x1xf32>
    %cst_22 = arith.constant 0.000000e+00 : f32
    %42 = vector.broadcast %cst_22 : f32 to vector<8x1xf32>
    %43 = arith.maximumf %41, %42 : vector<8x1xf32>
    %44 = vector.broadcast %34 : vector<8x1xf32> to vector<8x32xf32>
    %45 = arith.subf %30, %44 : vector<8x32xf32>
    %cst_23 = arith.constant 9.99999974E-6 : f32
    %46 = vector.broadcast %cst_23 : f32 to vector<8x1xf32>
    %47 = arith.addf %43, %46 : vector<8x1xf32>
    %48 = math.rsqrt %47 : vector<8x1xf32>
    %49 = vector.broadcast %48 : vector<8x1xf32> to vector<8x32xf32>
    %50 = arith.mulf %45, %49 : vector<8x32xf32>
    %51 = vector.broadcast %8 : vector<1x32xf32> to vector<8x32xf32>
    %52 = arith.mulf %50, %51 : vector<8x32xf32>
    %53 = vector.broadcast %9 : vector<1x32xf32> to vector<8x32xf32>
    %54 = arith.addf %52, %53 : vector<8x32xf32>
    %cst_24 = arith.constant 0.000000e+00 : f32
    %55 = vector.broadcast %cst_24 : f32 to vector<8x32xf32>
    %56 = arith.maximumf %54, %55 : vector<8x32xf32>
    %57 = arith.truncf %56 : vector<8x32xf32> to vector<8x32xbf16>
    %c0_25 = arith.constant 0 : index
    %c0_26 = arith.constant 0 : index
    %58 = vector.load %arg7[%c0_25, %c0_26] : memref<32x128xbf16, #tpu.memory_space<vmem>>, vector<32x128xbf16>
    %cst_27 = arith.constant dense<0.000000e+00> : vector<8x128xf32>
    %59 = tpu.matmul %57, %58, %cst_27 {dimension_numbers = #tpu.dot_dimension_numbers<[1], [0], [0], [1], [0, 0, 1, 1], [], []>} : vector<8x32xbf16>, vector<32x128xbf16>, vector<8x128xf32> -> vector<8x128xf32>
    %60 = vector.extract_strided_slice %4 {offsets = [5, 0], sizes = [1, 32], strides = [1, 1]} : vector<10x32xf32> to vector<1x32xf32>
    %61 = vector.extract_strided_slice %4 {offsets = [6, 0], sizes = [1, 32], strides = [1, 1]} : vector<10x32xf32> to vector<1x32xf32>
    %62 = vector.extract_strided_slice %4 {offsets = [7, 0], sizes = [1, 32], strides = [1, 1]} : vector<10x32xf32> to vector<1x32xf32>
    %63 = vector.extract_strided_slice %4 {offsets = [8, 0], sizes = [1, 32], strides = [1, 1]} : vector<10x32xf32> to vector<1x32xf32>
    %64 = vector.extract_strided_slice %4 {offsets = [9, 0], sizes = [1, 32], strides = [1, 1]} : vector<10x32xf32> to vector<1x32xf32>
    %c0_28 = arith.constant 0 : index
    %c0_29 = arith.constant 0 : index
    %65 = vector.load %arg8[%c0_28, %c0_29] : memref<16x32xbf16, #tpu.memory_space<vmem>>, vector<16x32xbf16>
    %cst_30 = arith.constant dense<0.000000e+00> : vector<8x32xf32>
    %66 = tpu.matmul %1, %65, %cst_30 {dimension_numbers = #tpu.dot_dimension_numbers<[1], [0], [0], [1], [0, 0, 1, 1], [], []>} : vector<8x16xbf16>, vector<16x32xbf16>, vector<8x32xf32> -> vector<8x32xf32>
    %c0_31 = arith.constant 0 : index
    %c0_32 = arith.constant 0 : index
    %67 = vector.load %arg9[%c0_31, %c0_32] : memref<8x32xbf16, #tpu.memory_space<vmem>>, vector<8x32xbf16>
    %cst_33 = arith.constant dense<0.000000e+00> : vector<8x32xf32>
    %68 = tpu.matmul %3, %67, %cst_33 {dimension_numbers = #tpu.dot_dimension_numbers<[1], [0], [0], [1], [0, 0, 1, 1], [], []>} : vector<8x8xbf16>, vector<8x32xbf16>, vector<8x32xf32> -> vector<8x32xf32>
    %69 = arith.addf %66, %68 : vector<8x32xf32>
    %70 = vector.broadcast %60 : vector<1x32xf32> to vector<8x32xf32>
    %71 = arith.addf %69, %70 : vector<8x32xf32>
    %cst_34 = arith.constant 0.000000e+00 : f32
    %72 = vector.broadcast %cst_34 : f32 to vector<8x32xf32>
    %73 = arith.maximumf %71, %72 : vector<8x32xf32>
    %74 = arith.truncf %73 : vector<8x32xf32> to vector<8x32xbf16>
    %c0_35 = arith.constant 0 : index
    %c0_36 = arith.constant 0 : index
    %75 = vector.load %arg10[%c0_35, %c0_36] : memref<32x32xbf16, #tpu.memory_space<vmem>>, vector<32x32xbf16>
    %cst_37 = arith.constant dense<0.000000e+00> : vector<8x32xf32>
    %76 = tpu.matmul %74, %75, %cst_37 {dimension_numbers = #tpu.dot_dimension_numbers<[1], [0], [0], [1], [0, 0, 1, 1], [], []>} : vector<8x32xbf16>, vector<32x32xbf16>, vector<8x32xf32> -> vector<8x32xf32>
    %77 = vector.broadcast %61 : vector<1x32xf32> to vector<8x32xf32>
    %78 = arith.addf %76, %77 : vector<8x32xf32>
    %cst_38 = arith.constant 0.000000e+00 : f32
    %79 = vector.broadcast %cst_38 : f32 to vector<8x32xf32>
    %80 = arith.maximumf %78, %79 : vector<8x32xf32>
    %81 = arith.truncf %80 : vector<8x32xf32> to vector<8x32xbf16>
    %c0_39 = arith.constant 0 : index
    %c0_40 = arith.constant 0 : index
    %82 = vector.load %arg11[%c0_39, %c0_40] : memref<32x32xbf16, #tpu.memory_space<vmem>>, vector<32x32xbf16>
    %cst_41 = arith.constant dense<0.000000e+00> : vector<8x32xf32>
    %83 = tpu.matmul %81, %82, %cst_41 {dimension_numbers = #tpu.dot_dimension_numbers<[1], [0], [0], [1], [0, 0, 1, 1], [], []>} : vector<8x32xbf16>, vector<32x32xbf16>, vector<8x32xf32> -> vector<8x32xf32>
    %84 = vector.broadcast %62 : vector<1x32xf32> to vector<8x32xf32>
    %85 = arith.addf %83, %84 : vector<8x32xf32>
    %cst_42 = arith.constant dense<0.000000e+00> : vector<8xf32>
    %86 = vector.multi_reduction <add>, %85, %cst_42 [1] : vector<8x32xf32> to vector<8xf32>
    %87 = vector.shape_cast %86 : vector<8xf32> to vector<8x1xf32>
    %cst_43 = arith.constant 3.200000e+01 : f32
    %88 = vector.broadcast %cst_43 : f32 to vector<8x1xf32>
    %89 = arith.divf %87, %88 : vector<8x1xf32>
    %90 = arith.mulf %85, %85 : vector<8x32xf32>
    %cst_44 = arith.constant dense<0.000000e+00> : vector<8xf32>
    %91 = vector.multi_reduction <add>, %90, %cst_44 [1] : vector<8x32xf32> to vector<8xf32>
    %92 = vector.shape_cast %91 : vector<8xf32> to vector<8x1xf32>
    %cst_45 = arith.constant 3.200000e+01 : f32
    %93 = vector.broadcast %cst_45 : f32 to vector<8x1xf32>
    %94 = arith.divf %92, %93 : vector<8x1xf32>
    %95 = arith.mulf %89, %89 : vector<8x1xf32>
    %96 = arith.subf %94, %95 : vector<8x1xf32>
    %cst_46 = arith.constant 0.000000e+00 : f32
    %97 = vector.broadcast %cst_46 : f32 to vector<8x1xf32>
    %98 = arith.maximumf %96, %97 : vector<8x1xf32>
    %99 = vector.broadcast %89 : vector<8x1xf32> to vector<8x32xf32>
    %100 = arith.subf %85, %99 : vector<8x32xf32>
    %cst_47 = arith.constant 9.99999974E-6 : f32
    %101 = vector.broadcast %cst_47 : f32 to vector<8x1xf32>
    %102 = arith.addf %98, %101 : vector<8x1xf32>
    %103 = math.rsqrt %102 : vector<8x1xf32>
    %104 = vector.broadcast %103 : vector<8x1xf32> to vector<8x32xf32>
    %105 = arith.mulf %100, %104 : vector<8x32xf32>
    %106 = vector.broadcast %63 : vector<1x32xf32> to vector<8x32xf32>
    %107 = arith.mulf %105, %106 : vector<8x32xf32>
    %108 = vector.broadcast %64 : vector<1x32xf32> to vector<8x32xf32>
    %109 = arith.addf %107, %108 : vector<8x32xf32>
    %cst_48 = arith.constant 0.000000e+00 : f32
    %110 = vector.broadcast %cst_48 : f32 to vector<8x32xf32>
    %111 = arith.maximumf %109, %110 : vector<8x32xf32>
    %112 = arith.truncf %111 : vector<8x32xf32> to vector<8x32xbf16>
    %c0_49 = arith.constant 0 : index
    %c0_50 = arith.constant 0 : index
    %113 = vector.load %arg12[%c0_49, %c0_50] : memref<32x128xbf16, #tpu.memory_space<vmem>>, vector<32x128xbf16>
    %cst_51 = arith.constant dense<0.000000e+00> : vector<8x128xf32>
    %114 = tpu.matmul %112, %113, %cst_51 {dimension_numbers = #tpu.dot_dimension_numbers<[1], [0], [0], [1], [0, 0, 1, 1], [], []>} : vector<8x32xbf16>, vector<32x128xbf16>, vector<8x128xf32> -> vector<8x128xf32>
    %115 = arith.addf %59, %114 : vector<8x128xf32>
    %c0_52 = arith.constant 0 : index
    %c0_53 = arith.constant 0 : index
    %116 = vector.load %arg14[%c0_52, %c0_53] : memref<1x128xf32, #tpu.memory_space<vmem>>, vector<1x128xf32>
    %117 = vector.broadcast %116 : vector<1x128xf32> to vector<8x128xf32>
    %118 = arith.addf %115, %117 : vector<8x128xf32>
    %c0_54 = arith.constant 0 : index
    %c0_55 = arith.constant 0 : index
    %119 = vector.load %arg15[%c0_54, %c0_55] : memref<8x128xf32, #tpu.memory_space<vmem>>, vector<8x128xf32>
    tpu.vector_store %arg15[%c0_54, %c0_55], %118 {strides = array<i32>} : memref<8x128xf32, #tpu.memory_space<vmem>>, vector<8x128xf32>,
    return
  }
  func.func @transform_0(%arg0: i32) -> (i32, i32) {
    %c0_i32 = arith.constant 0 : i32
    %c0_i32_0 = arith.constant 0 : i32
    return %arg0, %c0_i32 : i32, i32
  }
  func.func @transform_1(%arg0: i32) -> (i32, i32) {
    %c0_i32 = arith.constant 0 : i32
    %c0_i32_0 = arith.constant 0 : i32
    return %arg0, %c0_i32 : i32, i32
  }
  func.func @transform_2(%arg0: i32) -> (i32, i32) {
    %c0_i32 = arith.constant 0 : i32
    %c0_i32_0 = arith.constant 0 : i32
    %c0_i32_1 = arith.constant 0 : i32
    return %c0_i32, %c0_i32_0 : i32, i32
  }
  func.func @transform_3(%arg0: i32) -> (i32, i32) {
    %c0_i32 = arith.constant 0 : i32
    %c0_i32_0 = arith.constant 0 : i32
    %c0_i32_1 = arith.constant 0 : i32
    return %c0_i32, %c0_i32_0 : i32, i32
  }
  func.func @transform_4(%arg0: i32) -> (i32, i32) {
    %c0_i32 = arith.constant 0 : i32
    %c0_i32_0 = arith.constant 0 : i32
    %c0_i32_1 = arith.constant 0 : i32
    return %c0_i32, %c0_i32_0 : i32, i32
  }
  func.func @transform_5(%arg0: i32) -> (i32, i32) {
    %c0_i32 = arith.constant 0 : i32
    %c0_i32_0 = arith.constant 0 : i32
    %c0_i32_1 = arith.constant 0 : i32
    return %c0_i32, %c0_i32_0 : i32, i32
  }
  func.func @transform_6(%arg0: i32) -> (i32, i32) {
    %c0_i32 = arith.constant 0 : i32
    %c0_i32_0 = arith.constant 0 : i32
    %c0_i32_1 = arith.constant 0 : i32
    return %c0_i32, %c0_i32_0 : i32, i32
  }
  func.func @transform_7(%arg0: i32) -> (i32, i32) {
    %c0_i32 = arith.constant 0 : i32
    %c0_i32_0 = arith.constant 0 : i32
    %c0_i32_1 = arith.constant 0 : i32
    return %c0_i32, %c0_i32_0 : i32, i32
  }
  func.func @transform_8(%arg0: i32) -> (i32, i32) {
    %c0_i32 = arith.constant 0 : i32
    %c0_i32_0 = arith.constant 0 : i32
    %c0_i32_1 = arith.constant 0 : i32
    return %c0_i32, %c0_i32_0 : i32, i32
  }
  func.func @transform_9(%arg0: i32) -> (i32, i32) {
    %c0_i32 = arith.constant 0 : i32
    %c0_i32_0 = arith.constant 0 : i32
    %c0_i32_1 = arith.constant 0 : i32
    return %c0_i32, %c0_i32_0 : i32, i32
  }
  func.func @transform_10(%arg0: i32) -> (i32, i32) {
    %c0_i32 = arith.constant 0 : i32
    %c0_i32_0 = arith.constant 0 : i32
    %c0_i32_1 = arith.constant 0 : i32
    return %c0_i32, %c0_i32_0 : i32, i32
  }
  func.func @transform_11(%arg0: i32) -> (i32, i32) {
    %c0_i32 = arith.constant 0 : i32
    %c0_i32_0 = arith.constant 0 : i32
    %c0_i32_1 = arith.constant 0 : i32
    return %c0_i32, %c0_i32_0 : i32, i32
  }
  func.func @transform_12(%arg0: i32) -> (i32, i32) {
    %c0_i32 = arith.constant 0 : i32
    %c0_i32_0 = arith.constant 0 : i32
    %c0_i32_1 = arith.constant 0 : i32
    return %c0_i32, %c0_i32_0 : i32, i32
  }
  func.func @transform_13(%arg0: i32) -> (i32, i32) {
    %c0_i32 = arith.constant 0 : i32
    %c0_i32_0 = arith.constant 0 : i32
    %c0_i32_1 = arith.constant 0 : i32
    return %c0_i32, %c0_i32_0 : i32, i32
  }
  func.func @transform_14(%arg0: i32) -> (i32, i32) {
    %c0_i32 = arith.constant 0 : i32
    %c0_i32_0 = arith.constant 0 : i32
    return %arg0, %c0_i32 : i32, i32
  }
}

</mosaic_0001>

<bundles_post_ra>
// kernel: tpu_custom_call.1
= control target key start
LH: loop header
LB: loop body
LE: loop exit
PB: predicated region body
PF: predicated region fallthrough
CT: control target
= control target key end

     0   :  { %19 = vsyncpa [#allocation3], 0  ;;  %s1255_s0 = inlined_call_operand.hbm [shape: f32[8,16], index: 0, kind: input, shape index: {}]   ;;  %s1256_s1 = inlined_call_operand.hbm [shape: f32[8,8], index: 1, kind: input, shape index: {}]   ;;  %s1257_s2 = inlined_call_operand.hbm [shape: bf16[16,32], index: 2, kind: input, shape index: {}]   ;;  %s1258_s3 = inlined_call_operand.hbm [shape: bf16[8,32], index: 3, kind: input, shape index: {}]   ;;  %s1259_s4 = inlined_call_operand.hbm [shape: bf16[32,32], index: 4, kind: input, shape index: {}]   ;;  %s1260_s5 = inlined_call_operand.hbm [shape: bf16[32,32], index: 5, kind: input, shape index: {}]   ;;  %s1261_s6 = inlined_call_operand.hbm [shape: bf16[32,128], index: 6, kind: input, shape index: {}]   ;;  %s1262_s7 = inlined_call_operand.hbm [shape: bf16[16,32], index: 7, kind: input, shape index: {}]   ;;  %s1263_s8 = inlined_call_operand.vmem [shape: bf16[8,32], index: 8, kind: input, shape index: {}]   ;;  %s1264_s9 = inlined_call_operand.hbm [shape: bf16[32,32], index: 9, kind: input, shape index: {}]   ;;  %s1265_s10 = inlined_call_operand.hbm [shape: bf16[32,32], index: 10, kind: input, shape index: {}]   ;;  %s1266_s11 = inlined_call_operand.hbm [shape: bf16[32,128], index: 11, kind: input, shape index: {}]   ;;  %s1267_s12 = inlined_call_operand.hbm [shape: f32[10,32], index: 12, kind: input, shape index: {}]   ;;  %s1268_s13 = inlined_call_operand.vmem [shape: f32[1,128], index: 13, kind: input, shape index: {}]   ;;  %s1269_s14 = inlined_call_operand.hbm [shape: f32[8,128], index: 14, kind: output, shape index: {}]  }
   0x1   :  { %20 = vsyncpa [#allocation6], 0 }
   0x2   :  { %21 = vsyncpa [#allocation9], 0 }
   0x3   :  { %22 = vsyncpa [#allocation12], 0 }
   0x4   :  { %23 = vsyncpa [#allocation15], 0 }
   0x5   :  { %24 = vsyncpa [#allocation18], 0 }
   0x6   :  { %25 = vsyncpa [#allocation21], 0  ;;  %s43_s15 = sshll.u32 %s1256_s1, 4  ;;  %s44_s15 = int_to_ptr.hbm [resolvable:$true] %s43_s15 }
   0x7   :  { %26 = vsyncpa [#allocation4], 0  ;;  %s1061_s16 = smov [#allocation5]   ;;  %s67_s20 = sshll.u32 %s1258_s3, 4  ;;  %s68_s20 = int_to_ptr.hbm [resolvable:$true] %s67_s20 }
   0x8   :  { %s45_s17 = sshll.u32 %s1061_s16, 4  ;;  %s1062_s21 = smov [#allocation8]   ;;  %s46_s17 = int_to_ptr.vmem [resolvable:$true] %s45_s17 }
   0x9   :  { %48 = dma.hbm_to_vmem [thread:$0]  %s44_s15, 128, %s46_s17, [#allocation6]  }
   0xa   :  { %s69_s22 = sshll.u32 %s1062_s21, 4  ;;  %s90_s25 = sshll.u32 %s1260_s5, 4  ;;  %s70_s22 = int_to_ptr.vmem [resolvable:$true] %s69_s22  ;;  %s91_s25 = int_to_ptr.hbm [resolvable:$true] %s90_s25 }
   0xb   :  { %72 = dma.hbm_to_vmem [thread:$0]  %s68_s20, 64, %s70_s22, [#allocation9]  }
   0xc   :  { %s1063_s1 = smov [#allocation11]   ;;  %s116_s29 = sshll.u32 %s1262_s7, 4  ;;  %s117_s29 = int_to_ptr.hbm [resolvable:$true] %s116_s29 }
   0xd   :  { %s92_s26 = sshll.u32 %s1063_s1, 4  ;;  %s1064_s30 = smov 64   ;;  %s93_s26 = int_to_ptr.vmem [resolvable:$true] %s92_s26 }
   0xe   :  { %s1065_s3 = smov 4   ;;  %s1066_s15 = smov [#allocation14]  }
   0xf   :  { %98 = dma.hbm_to_vmem [thread:$0]  %s91_s25, 256, %s93_s26, [#allocation12], %s1064_s30, %s1064_s30, %s1065_s3  }
  0x10   :  { %s118_s16 = sshll.u32 %s1066_s15, 4  ;;  %s144_s5 = sshll.u32 %s1265_s10, 4  ;;  %s119_s16 = int_to_ptr.vmem [resolvable:$true] %s118_s16  ;;  %s145_s5 = int_to_ptr.hbm [resolvable:$true] %s144_s5 }
  0x11   :  { %124 = dma.hbm_to_vmem [thread:$0]  %s117_s29, 128, %s119_s16, [#allocation15], %s1064_s30, %s1064_s30, %s1065_s3  }
  0x12   :  { %s32_s20 = sshll.u32 %s1255_s0, 4  ;;  %s1067_s21 = smov [#allocation17]   ;;  %s33_s20 = int_to_ptr.hbm [resolvable:$true] %s32_s20 }
  0x13   :  { %s146_s22 = sshll.u32 %s1067_s21, 4  ;;  %s1068_s23 = smov [#allocation2]   ;;  %s147_s22 = int_to_ptr.vmem [resolvable:$true] %s146_s22 }
  0x14   :  { %152 = dma.hbm_to_vmem [thread:$0]  %s145_s5, 256, %s147_s22, [#allocation18], %s1064_s30, %s1064_s30, %s1065_s3  }
  0x15   :  { %s34_s10 = sshll.u32 %s1068_s23, 4  ;;  %s53_s1 = sshll.u32 %s1257_s2, 4  ;;  %s35_s10 = int_to_ptr.vmem [resolvable:$true] %s34_s10  ;;  %s54_s1 = int_to_ptr.hbm [resolvable:$true] %s53_s1 }
  0x16   :  { %37 = dma.hbm_to_vmem [thread:$0]  %s33_s20, 128, %s35_s10, [#allocation3]  }
  0x17   :  { %s77_s0 = sshll.u32 %s1259_s4, 4  ;;  %s1069_s28 = smov [#allocation7]   ;;  %s78_s0 = int_to_ptr.hbm [resolvable:$true] %s77_s0 }
  0x18   :  { %s55_s29 = sshll.u32 %s1069_s28, 4  ;;  %s1070_s15 = smov [#allocation10]   ;;  %s56_s29 = int_to_ptr.vmem [resolvable:$true] %s55_s29 }
  0x19   :  { %61 = dma.hbm_to_vmem [thread:$0]  %s54_s1, 128, %s56_s29, [#allocation6], %s1064_s30, %s1064_s30, %s1065_s3  }
  0x1a   :  { %s79_s16 = sshll.u32 %s1070_s15, 4  ;;  %s103_s2 = sshll.u32 %s1261_s6, 4  ;;  %s80_s16 = int_to_ptr.vmem [resolvable:$true] %s79_s16  ;;  %s104_s2 = int_to_ptr.hbm [resolvable:$true] %s103_s2 }
  0x1b   :  { %85 = dma.hbm_to_vmem [thread:$0]  %s78_s0, 256, %s80_s16, [#allocation9], %s1064_s30, %s1064_s30, %s1065_s3  }
  0x1c   :  { %s131_s7 = sshll.u32 %s1264_s9, 4  ;;  %s1071_s19 = smov [#allocation13]   ;;  %s132_s7 = int_to_ptr.hbm [resolvable:$true] %s131_s7 }
  0x1d   :  { %s105_s20 = sshll.u32 %s1071_s19, 4  ;;  %s1072_s21 = smov [#allocation16]   ;;  %s106_s20 = int_to_ptr.vmem [resolvable:$true] %s105_s20 }
  0x1e   :  { %111 = dma.hbm_to_vmem [thread:$0]  %s104_s2, 256, %s106_s20, [#allocation12], %s1064_s30, %s1064_s30, %s1065_s3  }
  0x1f   :  { %s133_s6 = sshll.u32 %s1072_s21, 4  ;;  %s157_s10 = sshll.u32 %s1266_s11, 4  ;;  %s134_s6 = int_to_ptr.vmem [resolvable:$true] %s133_s6  ;;  %s158_s10 = int_to_ptr.hbm [resolvable:$true] %s157_s10 }
  0x20   :  { %139 = dma.hbm_to_vmem [thread:$0]  %s132_s7, 256, %s134_s6, [#allocation15], %s1064_s30, %s1064_s30, %s1065_s3  }
  0x21   :  { %s170_s25 = sshll.u32 %s1267_s12, 4  ;;  %s1073_s1 = smov [#allocation19]   ;;  %s171_s25 = int_to_ptr.hbm [resolvable:$true] %s170_s25 }
  0x22   :  { %s159_s26 = sshll.u32 %s1073_s1, 4  ;;  %s1074_s27 = smov [#allocation20]   ;;  %s160_s26 = int_to_ptr.vmem [resolvable:$true] %s159_s26 }
  0x23   :  { %165 = dma.hbm_to_vmem [thread:$0]  %s158_s10, 256, %s160_s26, [#allocation18], %s1064_s30, %s1064_s30, %s1065_s3  }
  0x24   :  { %s172_s11 = sshll.u32 %s1074_s27, 4  ;;  %s1075_s0 = smov 128   ;;  %s173_s11 = int_to_ptr.vmem [resolvable:$true] %s172_s11 }
  0x25   :  { %s1076_s28 = smov 8  }
  0x26   :  { %178 = dma.hbm_to_vmem [thread:$0]  %s171_s25, 256, %s173_s11, [#allocation21], %s1075_s0, %s1075_s0, %s1076_s28  }
  0x27   :  { %1045 = dma.done.wait [#allocation3], 128  }
  0x28   :  { %1046 = vsyncadd [#allocation3], 4294967168 }
  0x29   :  { %1047 = dma.done.wait [#allocation6], 256  }
  0x2a   :  { %1048 = vsyncadd [#allocation6], 4294967040 }
  0x2b   :  { %1049 = dma.done.wait [#allocation9], 320  }
  0x2c   :  { %1050 = vsyncadd [#allocation9], 4294966976 }
  0x2d   :  { %1051 = dma.done.wait [#allocation12], 512  }
  0x2e   :  { %1052 = vsyncadd [#allocation12], 4294966784 }
  0x2f   :  { %1053 = dma.done.wait [#allocation15], 384  }
  0x30   :  { %1054 = vsyncadd [#allocation15], 4294966912 }
  0x31   :  { %1055 = dma.done.wait [#allocation18], 512  }
  0x32   :  { %1056 = vsyncadd [#allocation18], 4294966784 }
  0x33   :  { %1057 = dma.done.wait [#allocation21], 256  }
  0x34   :  { %1058 = vsyncadd [#allocation21], 4294967040  ;;  %vm243_vm0 = vcmask 1043456   ;;  %v238_v0 = vld [vmem:[#allocation8] sm:$0xf]  ;;  %v694_v1 = vld [vmem:[#allocation7] sm:$0xff] }
  0x35   :  { %v232_v2 = vld [vmem:[#allocation5] sm:$0xff]  ;;  %v245_v3 = vsel %vm243_vm0, %v238_v0, 0  ;;  %v230_v5 = vld [vmem:[#allocation2] sm:$0xff]  ;;  %277 = vmatpush.bf16.msra.mxu1 %v694_v1  ;;  %vm239_vm1 = vcmask 64512   ;;  %vm266_vm2 = vcmask 130048   ;;  %v702_v13 = vld [vmem:[#allocation16] sm:$0xff] }
  0x36   :  { %v233_v4 = vpack.c.bf16 %v232_v2, %v232_v2  ;;  %v400_v6 = vld [vmem:[%s1263_s8] sm:$0xf]  ;;  %v701_v7 = vld [vmem:[#allocation14] sm:$0xff]  ;;  %254 = vmatpush.bf16.msra.mxu0 %v245_v3  ;;  %v231_v8 = vpack.c.bf16 %v230_v5, %v230_v5  ;;  %v696_v10 = vld [vmem:[#allocation10 + $0x8] sm:$0xff]  ;;  %vm304_vm3 = vcmask 261120   ;;  %v1077_v63 = vmov 32.0  }
  0x37   :  { %v402_v9 = vsel %vm243_vm0, %v400_v6, 0  ;;  %314 = vmatpush.bf16.msra.mxu2 %v696_v10  ;;  %v695_v11 = vld [vmem:[#allocation10] sm:$0xff]  ;;  %v1217_v14 = vld [vmem:[#allocation20] sm:$0xff]  ;;  %v698_v33 = vld [vmem:[#allocation11 + $0x8] sm:$0xff]  ;;  %727 = vrcp.f32 %v1077_v63  ;;  %s1078_s29 = smov [#allocation22]   ;;  %s612_s18 = sshll.u32 %s1269_s14, 4  ;;  %s613_s18 = int_to_ptr.hbm [resolvable:$true] %s612_s18 }
  0x38   :  { %633 = vmatmul.msk.bf16.vlgmr.msra.gmra.mxu1 %vm266_vm2, %v231_v8  ;;  %v703_v12 = vld [vmem:[#allocation16 + $0x8] sm:$0xff]  ;;  %v283_v15 = vperm.slane %v1217_v14, 0  ;;  %v436_v24 = vperm.slane %v1217_v14, 5  ;;  %349 = vmatpush.bf16.msra.mxu3 %v698_v33  ;;  %v697_v34 = vld [vmem:[#allocation11] sm:$0xff]  ;;  %v704_v36 = vld [vmem:[#allocation17] sm:$0xff]  ;;  %v291_v37 = vperm.slane %v1217_v14, 1 }
  0x39   :  { %430 = vmatpush.bf16.msrb.mxu1 %v701_v7  ;;  %628 = vmatmul.msk.bf16.vlgmr.msra.gmra.mxu0 %vm239_vm1, %v233_v4  ;;  %v705_v35 = vld [vmem:[#allocation17 + $0x8] sm:$0xff]  ;;  %v444_v43 = vperm.slane %v1217_v14, 6  ;;  %v327_v49 = vperm.slane %v1217_v14, 2  ;;  %v479_v56 = vperm.slane %v1217_v14, 7  ;;  %v700_v6 = vld [vmem:[#allocation13 + $0x8] sm:$0xff]  ;;  %v699_v10 = vld [vmem:[#allocation13] sm:$0xff] }
  0x3a   :  { %411 = vmatpush.bf16.msrb.mxu0 %v402_v9  ;;  %s610_s15 = sshll.u32 %s1078_s29, 4  ;;  %s611_s15 = int_to_ptr.vmem [resolvable:$true] %s610_s15 }
  0x3b   :  { %315 = vmatpush.bf16.msra.mxu2 %v695_v11 }
  0x3c   :  { %350 = vmatpush.bf16.msra.mxu3 %v697_v34  ;;  %v388_v34 = vperm.slane %v1217_v14, 3 }
  0x3d   :  { %v728_v0 = vpop.eup %727  ;;  %592 = vmatpush.bf16.msra.mxu1 %v700_v6 }
  0x3e   :  { %v360_v1 = vmul.f32 32.0, %v728_v0  ;;  %vm364_vm4 = vweird.f32 %v728_v0 }
  0x3f   :  { %466 = vmatpush.bf16.msrb.mxu2 %v703_v12 }
  0x40   :  { %501 = vmatpush.bf16.msrb.mxu3 %v705_v35  ;;  %v361_v2 = vsub.f32 1.0, %v360_v1 }
  0x41   :  { %593 = vmatpush.bf16.msra.mxu1 %v699_v10 }
  0x42   :  { %v362_v3 = vmul.f32 %v728_v0, %v361_v2 }
  0x43   :  { %467 = vmatpush.bf16.msrb.mxu2 %v702_v13 }
  0x44   :  { %502 = vmatpush.bf16.msrb.mxu3 %v704_v36 }
  0x48   :  { %657 = vmatmul.msk.bf16.vlgmr.msrb.gmra.mxu1 %vm266_vm2, %v231_v8 }
  0x49   :  { %652 = vmatmul.msk.bf16.vlgmr.msrb.gmra.mxu0 %vm239_vm1, %v233_v4  ;;  %v363_v4 = vadd.f32 %v728_v0, %v362_v3 }
  0x4b   :  { %v365_v5 = vsel %vm364_vm4, %v728_v0, %v363_v4 }
  0xb5   :  { %v279_v17 = vpop.f32.mrf.mxu1 }
  0xb6   :  { %v256_v16 = vpop.f32.mrf.mxu0 }
  0xb7   :  { %v280_v18 = vadd.f32 %v279_v17, %v256_v16  ;;  %v707_v17 = vld [vmem:[#allocation19 + $0x8] sm:$0xff] }
  0xb8   :  { %564 = vmatpush.bf16.msra.mxu0 %v707_v17 }
  0xb9   :  { %v284_v19 = vadd.f32 %v283_v15, %v280_v18 }
  0xbb   :  { %v285_v20 = vmax.f32 %v284_v19, 0.0  ;;  %v706_v19 = vld [vmem:[#allocation19] sm:$0xff] }
  0xbc   :  { %565 = vmatpush.bf16.msra.mxu0 %v706_v19 }
  0xbd   :  { %v286_v21 = vpack.c.bf16 %v285_v20, %v285_v20  ;;  %v281_v23 = vpop.f32.mrf.mxu1 }
  0xbe   :  { %v258_v22 = vpop.f32.mrf.mxu0 }
  0xbf   :  { %642 = vmatmul.msk.bf16.vlgmr.msra.gmra.mxu2 %vm304_vm3, %v286_v21 }
  0xc5   :  { %v432_v26 = vpop.f32.mrf.mxu1 }
  0xc6   :  { %v413_v25 = vpop.f32.mrf.mxu0 }
  0xc7   :  { %v433_v27 = vadd.f32 %v432_v26, %v413_v25 }
  0xc9   :  { %v437_v28 = vadd.f32 %v436_v24, %v433_v27 }
  0xcb   :  { %v438_v29 = vmax.f32 %v437_v28, 0.0 }
  0xcd   :  { %v439_v30 = vpack.c.bf16 %v438_v29, %v438_v29  ;;  %v434_v32 = vpop.f32.mrf.mxu1 }
  0xce   :  { %v415_v31 = vpop.f32.mrf.mxu0 }
  0xcf   :  { %666 = vmatmul.msk.bf16.vlgmr.msrb.gmra.mxu2 %vm304_vm3, %v439_v30 }
 0x142   :  { %v317_v38 = vpop.f32.mrf.mxu2 }
 0x143   :  { %v318_v39 = vadd.f32 %v317_v38, %v291_v37  ;;  %v390_v37 = vperm.slane %v1217_v14, 4 }
 0x145   :  { %v321_v40 = vmax.f32 %v318_v39, 0.0 }
 0x147   :  { %v322_v41 = vpack.c.bf16 %v321_v40, %v321_v40 }
 0x149   :  { %651 = vmatmul.msk.bf16.vlgmr.msra.gmra.mxu3 %vm304_vm3, %v322_v41 }
 0x14a   :  { %v319_v42 = vpop.f32.mrf.mxu2 }
 0x152   :  { %v469_v44 = vpop.f32.mrf.mxu2 }
 0x153   :  { %v470_v45 = vadd.f32 %v469_v44, %v444_v43 }
 0x155   :  { %v473_v46 = vmax.f32 %v470_v45, 0.0 }
 0x157   :  { %v474_v47 = vpack.c.bf16 %v473_v46, %v473_v46  ;;  %v235_v46 = vld [vmem:[#allocation20 + $0x8] sm:$0x3] }
 0x159   :  { %675 = vmatmul.msk.bf16.vlgmr.msrb.gmra.mxu3 %vm304_vm3, %v474_v47 }
 0x15a   :  { %v471_v48 = vpop.f32.mrf.mxu2 }
 0x1cc   :  { %v352_v50 = vpop.f32.mrf.mxu3 }
 0x1cd   :  { %v1228_v51 = vadd.f32 %v352_v50, %v327_v49  ;;  %v533_v50 = vperm.slane %v235_v46, 0 }
 0x1cf   :  { %v356_v52 = vsel %vm304_vm3, %v1228_v51, 0.0  ;;  %v367_v53 = vmul.f32 %v1228_v51, %v1228_v51 }
 0x1d0   :  { %357 = vadd.xlane.f32.xlu0 %v356_v52  ;;  %v535_v52 = vperm.slane %v235_v46, 1 }
 0x1d1   :  { %v368_v54 = vsel %vm304_vm3, %v367_v53, 0.0 }
 0x1d2   :  { %369 = vadd.xlane.f32.xlu1 %v368_v54 }
 0x1d4   :  { %v354_v55 = vpop.f32.mrf.mxu3 }
 0x1dc   :  { %v504_v57 = vpop.f32.mrf.mxu3 }
 0x1dd   :  { %v1236_v58 = vadd.f32 %v504_v57, %v479_v56 }
 0x1df   :  { %v508_v59 = vsel %vm304_vm3, %v1236_v58, 0.0  ;;  %v512_v60 = vmul.f32 %v1236_v58, %v1236_v58 }
 0x1e0   :  { %509 = vadd.xlane.f32.xlu0 %v508_v59 }
 0x1e1   :  { %v513_v61 = vsel %vm304_vm3, %v512_v60, 0.0  ;;  %v726_v60 = vld [vmem:[%s1268_s13] ss:$0 sm:$0xff] }
 0x1e2   :  { %514 = vadd.xlane.f32.xlu1 %v513_v61 }
 0x1e4   :  { %v506_v62 = vpop.f32.mrf.mxu3 }
 0x243   :  { %v358_v7 = vpop.xlane.xlu0 %357 }
 0x244   :  { %v366_v8 = vmul.f32 %v365_v5, %v358_v7 }
 0x245   :  { %v370_v9 = vpop.xlane.xlu1 %369 }
 0x246   :  { %v372_v11 = vmul.f32 %v366_v8, %v366_v8  ;;  %v371_v12 = vmul.f32 %v370_v9, %v365_v5  ;;  %v375_v33 = vsub.f32 %v1228_v51, %v366_v8 }
 0x248   :  { %v373_v13 = vsub.f32 %v371_v12, %v372_v11 }
 0x24a   :  { %v374_v15 = vmax.f32 %v373_v13, 0.0 }
 0x24c   :  { %v376_v16 = vadd.f32 1e-05, %v374_v15 }
 0x24e   :  { %729 = vrsqrt.f32 %v376_v16  ;;  %vm383_vm6 = vweird.f32 %v376_v16 }
 0x253   :  { %v510_v18 = vpop.xlane.xlu0 %509 }
 0x254   :  { %v730_v20 = vpop.eup %729  ;;  %v511_v21 = vmul.f32 %v510_v18, %v365_v5 }
 0x255   :  { %v378_v22 = vmul.f32 %v730_v20, %v376_v16  ;;  %v515_v23 = vpop.xlane.xlu1 %514  ;;  %vm384_vm5 = vweird.f32 %v730_v20 }
 0x256   :  { %v517_v24 = vmul.f32 %v511_v21, %v511_v21  ;;  %v516_v25 = vmul.f32 %v515_v23, %v365_v5  ;;  %vm385_vm7 = vmor %vm383_vm6, %vm384_vm5  ;;  %v520_v49 = vsub.f32 %v1236_v58, %v511_v21 }
 0x257   :  { %v379_v26 = vmul.f32 %v730_v20, %v378_v22 }
 0x258   :  { %v518_v27 = vsub.f32 %v516_v25, %v517_v24 }
 0x259   :  { %v380_v28 = vmul.f32 0.5, %v379_v26 }
 0x25a   :  { %v519_v29 = vmax.f32 %v518_v27, 0.0 }
 0x25b   :  { %v381_v30 = vsub.f32 1.5, %v380_v28 }
 0x25c   :  { %v521_v31 = vadd.f32 1e-05, %v519_v29 }
 0x25d   :  { %v382_v32 = vmul.f32 %v730_v20, %v381_v30 }
 0x25e   :  { %731 = vrsqrt.f32 %v521_v31  ;;  %vm528_vm9 = vweird.f32 %v521_v31 }
 0x25f   :  { %v386_v35 = vsel %vm385_vm7, %v730_v20, %v382_v32 }
 0x260   :  { %v387_v36 = vmul.f32 %v386_v35, %v375_v33 }
 0x262   :  { %v389_v38 = vmul.f32 %v388_v34, %v387_v36 }
 0x264   :  { %v732_v39 = vpop.eup %731  ;;  %v391_v40 = vadd.f32 %v390_v37, %v389_v38 }
 0x265   :  { %v523_v41 = vmul.f32 %v732_v39, %v521_v31  ;;  %vm529_vm8 = vweird.f32 %v732_v39 }
 0x266   :  { %v392_v42 = vmax.f32 %v391_v40, 0.0  ;;  %vm530_vm10 = vmor %vm528_vm9, %vm529_vm8 }
 0x267   :  { %v524_v43 = vmul.f32 %v732_v39, %v523_v41 }
 0x268   :  { %v393_v44 = vpack.c.bf16 %v392_v42, %v392_v42 }
 0x269   :  { %v525_v45 = vmul.f32 0.5, %v524_v43 }
 0x26a   :  { %693 = vmatmul.msk.bf16.vlgmr.msra.gmra.mxu1 %vm304_vm3, %v393_v44 }
 0x26b   :  { %v526_v47 = vsub.f32 1.5, %v525_v45 }
 0x26d   :  { %v527_v48 = vmul.f32 %v732_v39, %v526_v47 }
 0x26f   :  { %v531_v14 = vsel %vm530_vm10, %v732_v39, %v527_v48 }
 0x270   :  { %v532_v51 = vmul.f32 %v531_v14, %v520_v49 }
 0x272   :  { %v534_v53 = vmul.f32 %v533_v50, %v532_v51 }
 0x274   :  { %v536_v54 = vadd.f32 %v535_v52, %v534_v53 }
 0x276   :  { %v537_v55 = vmax.f32 %v536_v54, 0.0 }
 0x278   :  { %v538_v56 = vpack.c.bf16 %v537_v55, %v537_v55 }
 0x27a   :  { %684 = vmatmul.msk.bf16.vlgmr.msra.gmra.mxu0 %vm304_vm3, %v538_v56 }
 0x2e7   :  { %v595_v57 = vpop.f32.mrf.mxu1 }
 0x2ef   :  { %v597_v59 = vpop.f32.mrf.mxu1 }
 0x2f7   :  { %v567_v61 = vpop.f32.mrf.mxu0 }
 0x2f8   :  { %v596_v58 = vadd.f32 %v595_v57, %v567_v61 }
 0x2fa   :  { %v603_v62 = vadd.f32 %v726_v60, %v596_v58 }
 0x2fc   :  { %604 = vst [vmem:[#allocation22] sm:$0xff] %v603_v62 }
 0x2fd   :  { %615 = dma.vmem_to_hbm [thread:$0]  %s611_s15, 128, %s613_s18, [#allocation4]  }
 0x2ff   :  { %v569_v63 = vpop.f32.mrf.mxu0 }
 0x300   :  { %1059 = dma.done.wait [#allocation4], 128  }
 0x301   :  { %1060 = vsyncadd [#allocation4], 4294967168 }
 0x302   :  { %620 = vsyncpa [#allocation3], 1 }
 0x303   :  { %621 = vsyncpa [#allocation6], 1 }
 0x304   :  { %622 = vsyncpa [#allocation9], 1 }
 0x305   :  { %623 = vsyncpa [#allocation12], 1 }
 0x306   :  { %624 = vsyncpa [#allocation15], 1 }
 0x307   :  { %625 = vsyncpa [#allocation18], 1 }
 0x308   :  { %626 = vsyncpa [#allocation21], 1 }
 0x309   :  { %627 = vsyncpa [#allocation4], 1 }

</bundles_post_ra>
